<compile_context>
chip_gen: v6e
topology: v6e:2x2x1
jax: 0.10.0
libtpu: 0.0.40
codegen_flags: <defaults>
</compile_context>

<pallas_src>
import math

import jax
import jax.numpy as jnp
from jax.experimental import pallas as pl
from jax.experimental.pallas import tpu as pltpu

SEQ = 8        # input_shape[0] (sequence length)
IN_DIM = 3     # input_shape[1]
UNITS = 32     # neurons / layers (small demo size; 4*UNITS = 128 = one lane row)

# --- packed-parameter slab layout (rows; every section starts on an 8-row
# sublane-tile boundary so in-kernel slices need no sublane shuffles) ---------
ROW_WI0 = 0        # rows 0..2   : W_ih0^T (IN_DIM, 4U)   (g-cols pre-scaled x2)
ROW_WH0 = 8        # rows 8..39  : W_hh0^T (U, 4U)        (g-cols pre-scaled x2)
ROW_B0 = 40        # row 40      : b_ih0 + b_hh0 (1, 4U)  (g-cols pre-scaled x2)
ROW_WI1 = 48       # rows 48..79 : W_ih1^T
ROW_B1 = 80        # row 80      : b_ih1 + b_hh1
ROW_WI2 = 88       # rows 88..119: W_ih2^T
ROW_B2 = 120       # row 120     : b_ih2 + b_hh2
ROW_WO = 128       # row 128     : output weight, lanes 0..U-1
ROW_BO = 136       # row 136     : output bias, lane 0
PACK_ROWS = 144    # (144, 128) f32  ~= 72 KiB


def manual_model_kernel(x_ref, p_ref, out_ref):
    U = UNITS

    x = x_ref[...]                                   # (SEQ, IN_DIM)
    wh0 = p_ref[ROW_WH0:ROW_WH0 + U, :]              # (U, 4U)
    b0 = p_ref[ROW_B0:ROW_B0 + 1, :]                 # (1, 4U)
    wi1 = p_ref[ROW_WI1:ROW_WI1 + U, :]              # (U, 4U)
    b1 = p_ref[ROW_B1:ROW_B1 + 1, :]                 # (1, 4U)
    wi2 = p_ref[ROW_WI2:ROW_WI2 + U, :]              # (U, 4U)
    b2 = p_ref[ROW_B2:ROW_B2 + 1, :]                 # (1, 4U)
    wo = p_ref[ROW_WO:ROW_WO + 1, 0:U]               # (1, U)
    bo = p_ref[ROW_BO:ROW_BO + 1, 0:1]               # (1, 1)

    # Hoisted LSTM0 input projection as 3 VPU broadcast-MACs (K=3 MXU matmul
    # is essentially all fill/drain latency and step 0 would stall on its pop).
    xw0 = b0                                         # (1, 4U) -> broadcasts
    for k in range(IN_DIM):
        xw0 = xw0 + x[:, k:k + 1] * p_ref[ROW_WI0 + k:ROW_WI0 + k + 1, :]
    # xw0: (SEQ, 4U); gate order along 4U: [i | f | 2*g | o]

    def activate(gates):
        # One full-width sigmoid; the g block of `gates` holds 2*g (weights
        # pre-scaled), so tanh(g) = 2*sigmoid(2g) - 1 is just VPU mul+sub.
        sig = jax.nn.sigmoid(gates)                  # (1, 4U)
        tg = 2.0 * sig[:, 2 * U:3 * U] - 1.0         # (1, U) == tanh(g)
        return sig, tg

    # --- LSTM #0 recurrence, fully unrolled (SEQ is a small static constant).
    # t = 0: h = c = 0, so the h@W_hh matmul and f*c term vanish.
    sig, tg = activate(xw0[0:1, :])
    c = sig[:, 0:U] * tg
    h = sig[:, 3 * U:4 * U] * jnp.tanh(c)
    for t in range(1, SEQ):
        gates = xw0[t:t + 1, :] + jnp.dot(h, wh0,
                                          preferred_element_type=jnp.float32)
        sig, tg = activate(gates)
        c = sig[:, U:2 * U] * c + sig[:, 0:U] * tg
        h = sig[:, 3 * U:4 * U] * jnp.tanh(c)
    h1 = h

    def zero_state_cell(a, wi, b):
        # With h = c = 0: h@W_hh vanishes and f*c == 0, so
        #   c_new = sigmoid(i) * tanh(g),  h_new = sigmoid(o) * tanh(c_new).
        gates = jnp.dot(a, wi, preferred_element_type=jnp.float32) + b
        sig, tg = activate(gates)
        return sig[:, 3 * U:4 * U] * jnp.tanh(sig[:, 0:U] * tg)

    # LSTM #1: single step on tanh(h1), zero state.
    h2 = zero_state_cell(jnp.tanh(h1), wi1, b1)
    # LSTM #2: single step on tanh(h2), zero state.
    h3 = zero_state_cell(jnp.tanh(h2), wi2, b2)

    # tanh(h3) + dropout are computed in the torch forward but then discarded;
    # the head reads h_3 directly: sigmoid(Linear(h_3.view(-1, units))).
    # Head as VPU multiply + lane reduction (no tiny MXU matmul in epilogue).
    logit = jnp.sum(h3 * wo, axis=-1, keepdims=True) + bo    # (1, 1)
    out_ref[...] = jax.nn.sigmoid(logit)


def pack_params(params):
    """Pack the 9 live parameter tensors into one (PACK_ROWS, 4U) f32 slab.

    The g-gate columns (2U:3U) of all LSTM input/recurrent weights and biases
    are pre-scaled by 2 so the kernel can recover tanh(g) from the full-width
    sigmoid result (tanh(x) = 2*sigmoid(2x) - 1).
    """
    (wi0, wh0, b0, wi1, wh1, b1, wi2, wh2, b2, wo, bo) = params
    del wh1, wh2   # multiply a zero hidden state in the torch forward -> dead

    U = UNITS

    def scale_g(a):
        return a.at[..., 2 * U:3 * U].multiply(2.0)

    slab = jnp.zeros((PACK_ROWS, 4 * U), jnp.float32)
    slab = slab.at[ROW_WI0:ROW_WI0 + IN_DIM, :].set(scale_g(wi0))
    slab = slab.at[ROW_WH0:ROW_WH0 + U, :].set(scale_g(wh0))
    slab = slab.at[ROW_B0:ROW_B0 + 1, :].set(scale_g(b0))
    slab = slab.at[ROW_WI1:ROW_WI1 + U, :].set(scale_g(wi1))
    slab = slab.at[ROW_B1:ROW_B1 + 1, :].set(scale_g(b1))
    slab = slab.at[ROW_WI2:ROW_WI2 + U, :].set(scale_g(wi2))
    slab = slab.at[ROW_B2:ROW_B2 + 1, :].set(scale_g(b2))
    slab = slab.at[ROW_WO:ROW_WO + 1, 0:U].set(wo.reshape(1, U))
    slab = slab.at[ROW_BO:ROW_BO + 1, 0:1].set(bo)
    return slab


def manual_model_forward(x, packed_params):
    # Batch is fixed to 1 by the torch forward's state re-feeding, so no grid:
    # the whole model (<100 KiB) lives in VMEM and per-grid-step overhead would
    # dwarf the work.  (If batching were ever added, a leading "parallel" grid
    # axis would let v7x's two TensorCores both run.)
    vmem = pl.BlockSpec(memory_space=pltpu.MemorySpace.VMEM)
    return pl.pallas_call(
        manual_model_kernel,
        out_shape=jax.ShapeDtypeStruct((1, 1), jnp.float32),
        in_specs=[vmem, vmem],
        out_specs=vmem,
    )(x, packed_params)


def init_params(key):
    """Deterministic init matching PyTorch's U(-1/sqrt(U), 1/sqrt(U)) scheme."""
    k = 1.0 / math.sqrt(UNITS)
    ks = jax.random.split(key, 14)

    def u(kk, shape):
        return jax.random.uniform(kk, shape, jnp.float32, minval=-k, maxval=k)

    wi0 = u(ks[0], (IN_DIM, 4 * UNITS))
    wh0 = u(ks[1], (UNITS, 4 * UNITS))
    b0 = u(ks[2], (1, 4 * UNITS)) + u(ks[3], (1, 4 * UNITS))   # b_ih + b_hh folded
    wi1 = u(ks[4], (UNITS, 4 * UNITS))
    wh1 = u(ks[5], (UNITS, 4 * UNITS))
    b1 = u(ks[6], (1, 4 * UNITS)) + u(ks[7], (1, 4 * UNITS))
    wi2 = u(ks[8], (UNITS, 4 * UNITS))
    wh2 = u(ks[9], (UNITS, 4 * UNITS))
    b2 = u(ks[10], (1, 4 * UNITS)) + u(ks[11], (1, 4 * UNITS))
    wo = u(ks[12], (UNITS, 1))
    bo = u(ks[13], (1, 1))
    return (wi0, wh0, b0, wi1, wh1, b1, wi2, wh2, b2, wo, bo)


def reference_forward(x, params):
    """Pure-JAX reference replicating the full torch forward semantics (batch=1),
    including the (algebraically dead) h@W_hh / f-gate terms in LSTM #1/#2."""
    (wi0, wh0, b0, wi1, wh1, b1, wi2, wh2, b2, wo, bo) = params

    def cell(x_row, h, c, wi, wh, b):
        gates = x_row @ wi + h @ wh + b
        i, f, g, o = jnp.split(gates, 4, axis=-1)
        c = jax.nn.sigmoid(f) * c + jax.nn.sigmoid(i) * jnp.tanh(g)
        h = jax.nn.sigmoid(o) * jnp.tanh(c)
        return h, c

    h = jnp.zeros((1, UNITS), jnp.float32)
    c = jnp.zeros((1, UNITS), jnp.float32)
    for t in range(SEQ):
        h, c = cell(x[t:t + 1, :], h, c, wi0, wh0, b0)
    z = jnp.zeros((1, UNITS), jnp.float32)
    h2, _ = cell(jnp.tanh(h), z, z, wi1, wh1, b1)
    h3, _ = cell(jnp.tanh(h2), z, z, wi2, wh2, b2)
    return jax.nn.sigmoid(h3 @ wo + bo)


if __name__ == "__main__":
    key = jax.random.PRNGKey(0)
    k_x, k_p = jax.random.split(key)
    x = jax.random.normal(k_x, (SEQ, IN_DIM), jnp.float32)   # torch input: (1, SEQ, IN_DIM)
    params = init_params(k_p)
    packed = pack_params(params)

    out = manual_model_forward(x, packed)
    out = jax.block_until_ready(out)

    ref = reference_forward(x, params)
    assert out.shape == (1, 1)
    assert jnp.allclose(out, ref, atol=1e-5, rtol=1e-5), (out, ref)
    print("KERNEL_OK")
</pallas_src>

<mosaic_0001>
module attributes {stable_mosaic.version = 11 : i64} {
  func.func @manual_model_kernel(%arg0: memref<8x3xf32, #tpu.memory_space<vmem>>, %arg1: memref<144x128xf32, #tpu.memory_space<vmem>>, %arg2: memref<1x1xf32, #tpu.memory_space<vmem>>) attributes {dimension_semantics = [], scalar_prefetch = 0 : i64, scratch_operands = 0 : i64, tpu.core_type = #tpu.core_type<tc>} {
    %c0 = arith.constant 0 : index
    %c0_0 = arith.constant 0 : index
    %0 = vector.load %arg0[%c0, %c0_0] : memref<8x3xf32, #tpu.memory_space<vmem>>, vector<8x3xf32>
    %c8 = arith.constant 8 : index
    %c0_1 = arith.constant 0 : index
    %1 = vector.load %arg1[%c8, %c0_1] : memref<144x128xf32, #tpu.memory_space<vmem>>, vector<32x128xf32>
    %c40 = arith.constant 40 : index
    %c0_2 = arith.constant 0 : index
    %2 = vector.load %arg1[%c40, %c0_2] : memref<144x128xf32, #tpu.memory_space<vmem>>, vector<1x128xf32>
    %c48 = arith.constant 48 : index
    %c0_3 = arith.constant 0 : index
    %3 = vector.load %arg1[%c48, %c0_3] : memref<144x128xf32, #tpu.memory_space<vmem>>, vector<32x128xf32>
    %c80 = arith.constant 80 : index
    %c0_4 = arith.constant 0 : index
    %4 = vector.load %arg1[%c80, %c0_4] : memref<144x128xf32, #tpu.memory_space<vmem>>, vector<1x128xf32>
    %c88 = arith.constant 88 : index
    %c0_5 = arith.constant 0 : index
    %5 = vector.load %arg1[%c88, %c0_5] : memref<144x128xf32, #tpu.memory_space<vmem>>, vector<32x128xf32>
    %c120 = arith.constant 120 : index
    %c0_6 = arith.constant 0 : index
    %6 = vector.load %arg1[%c120, %c0_6] : memref<144x128xf32, #tpu.memory_space<vmem>>, vector<1x128xf32>
    %c128 = arith.constant 128 : index
    %c0_7 = arith.constant 0 : index
    %7 = vector.load %arg1[%c128, %c0_7] : memref<144x128xf32, #tpu.memory_space<vmem>>, vector<1x32xf32>
    %c136 = arith.constant 136 : index
    %c0_8 = arith.constant 0 : index
    %8 = vector.load %arg1[%c136, %c0_8] : memref<144x128xf32, #tpu.memory_space<vmem>>, vector<1x1xf32>
    %9 = vector.extract_strided_slice %0 {offsets = [0, 0], sizes = [8, 1], strides = [1, 1]} : vector<8x3xf32> to vector<8x1xf32>
    %c0_9 = arith.constant 0 : index
    %c0_10 = arith.constant 0 : index
    %10 = vector.load %arg1[%c0_9, %c0_10] : memref<144x128xf32, #tpu.memory_space<vmem>>, vector<1x128xf32>
    %11 = vector.broadcast %9 : vector<8x1xf32> to vector<8x128xf32>
    %12 = vector.broadcast %10 : vector<1x128xf32> to vector<8x128xf32>
    %13 = arith.mulf %11, %12 : vector<8x128xf32>
    %14 = vector.broadcast %2 : vector<1x128xf32> to vector<8x128xf32>
    %15 = arith.addf %14, %13 : vector<8x128xf32>
    %16 = vector.extract_strided_slice %0 {offsets = [0, 1], sizes = [8, 1], strides = [1, 1]} : vector<8x3xf32> to vector<8x1xf32>
    %c1 = arith.constant 1 : index
    %c0_11 = arith.constant 0 : index
    %17 = vector.load %arg1[%c1, %c0_11] : memref<144x128xf32, #tpu.memory_space<vmem>>, vector<1x128xf32>
    %18 = vector.broadcast %16 : vector<8x1xf32> to vector<8x128xf32>
    %19 = vector.broadcast %17 : vector<1x128xf32> to vector<8x128xf32>
    %20 = arith.mulf %18, %19 : vector<8x128xf32>
    %21 = arith.addf %15, %20 : vector<8x128xf32>
    %22 = vector.extract_strided_slice %0 {offsets = [0, 2], sizes = [8, 1], strides = [1, 1]} : vector<8x3xf32> to vector<8x1xf32>
    %c2 = arith.constant 2 : index
    %c0_12 = arith.constant 0 : index
    %23 = vector.load %arg1[%c2, %c0_12] : memref<144x128xf32, #tpu.memory_space<vmem>>, vector<1x128xf32>
    %24 = vector.broadcast %22 : vector<8x1xf32> to vector<8x128xf32>
    %25 = vector.broadcast %23 : vector<1x128xf32> to vector<8x128xf32>
    %26 = arith.mulf %24, %25 : vector<8x128xf32>
    %27 = arith.addf %21, %26 : vector<8x128xf32>
    %28 = vector.extract_strided_slice %27 {offsets = [0, 0], sizes = [1, 128], strides = [1, 1]} : vector<8x128xf32> to vector<1x128xf32>
    %29 = arith.negf %28 : vector<1x128xf32>
    %30 = math.exp %29 : vector<1x128xf32>
    %cst = arith.constant 1.000000e+00 : f32
    %31 = vector.broadcast %cst : f32 to vector<1x128xf32>
    %32 = arith.addf %31, %30 : vector<1x128xf32>
    %33 = arith.divf %31, %32 : vector<1x128xf32>
    %34 = vector.extract_strided_slice %33 {offsets = [0, 64], sizes = [1, 32], strides = [1, 1]} : vector<1x128xf32> to vector<1x32xf32>
    %cst_13 = arith.constant 2.000000e+00 : f32
    %35 = vector.broadcast %cst_13 : f32 to vector<1x32xf32>
    %36 = arith.mulf %35, %34 : vector<1x32xf32>
    %cst_14 = arith.constant 1.000000e+00 : f32
    %37 = vector.broadcast %cst_14 : f32 to vector<1x32xf32>
    %38 = arith.subf %36, %37 : vector<1x32xf32>
    %39 = vector.extract_strided_slice %33 {offsets = [0, 0], sizes = [1, 32], strides = [1, 1]} : vector<1x128xf32> to vector<1x32xf32>
    %40 = arith.mulf %39, %38 : vector<1x32xf32>
    %41 = vector.extract_strided_slice %33 {offsets = [0, 96], sizes = [1, 32], strides = [1, 1]} : vector<1x128xf32> to vector<1x32xf32>
    %42 = math.tanh %40 : vector<1x32xf32>
    %43 = arith.mulf %41, %42 : vector<1x32xf32>
    %44 = vector.extract_strided_slice %27 {offsets = [1, 0], sizes = [1, 128], strides = [1, 1]} : vector<8x128xf32> to vector<1x128xf32>
    %cst_15 = arith.constant dense<0.000000e+00> : vector<1x128xf32>
    %45 = tpu.matmul %43, %1, %cst_15 {dimension_numbers = #tpu.dot_dimension_numbers<[1], [0], [0], [1], [0, 0, 1, 1], [], []>} : vector<1x32xf32>, vector<32x128xf32>, vector<1x128xf32> -> vector<1x128xf32>
    %46 = arith.addf %44, %45 : vector<1x128xf32>
    %47 = arith.negf %46 : vector<1x128xf32>
    %48 = math.exp %47 : vector<1x128xf32>
    %cst_16 = arith.constant 1.000000e+00 : f32
    %49 = vector.broadcast %cst_16 : f32 to vector<1x128xf32>
    %50 = arith.addf %49, %48 : vector<1x128xf32>
    %51 = arith.divf %49, %50 : vector<1x128xf32>
    %52 = vector.extract_strided_slice %51 {offsets = [0, 64], sizes = [1, 32], strides = [1, 1]} : vector<1x128xf32> to vector<1x32xf32>
    %cst_17 = arith.constant 2.000000e+00 : f32
    %53 = vector.broadcast %cst_17 : f32 to vector<1x32xf32>
    %54 = arith.mulf %53, %52 : vector<1x32xf32>
    %cst_18 = arith.constant 1.000000e+00 : f32
    %55 = vector.broadcast %cst_18 : f32 to vector<1x32xf32>
    %56 = arith.subf %54, %55 : vector<1x32xf32>
    %57 = vector.extract_strided_slice %51 {offsets = [0, 32], sizes = [1, 32], strides = [1, 1]} : vector<1x128xf32> to vector<1x32xf32>
    %58 = arith.mulf %57, %40 : vector<1x32xf32>
    %59 = vector.extract_strided_slice %51 {offsets = [0, 0], sizes = [1, 32], strides = [1, 1]} : vector<1x128xf32> to vector<1x32xf32>
    %60 = arith.mulf %59, %56 : vector<1x32xf32>
    %61 = arith.addf %58, %60 : vector<1x32xf32>
    %62 = vector.extract_strided_slice %51 {offsets = [0, 96], sizes = [1, 32], strides = [1, 1]} : vector<1x128xf32> to vector<1x32xf32>
    %63 = math.tanh %61 : vector<1x32xf32>
    %64 = arith.mulf %62, %63 : vector<1x32xf32>
    %65 = vector.extract_strided_slice %27 {offsets = [2, 0], sizes = [1, 128], strides = [1, 1]} : vector<8x128xf32> to vector<1x128xf32>
    %cst_19 = arith.constant dense<0.000000e+00> : vector<1x128xf32>
    %66 = tpu.matmul %64, %1, %cst_19 {dimension_numbers = #tpu.dot_dimension_numbers<[1], [0], [0], [1], [0, 0, 1, 1], [], []>} : vector<1x32xf32>, vector<32x128xf32>, vector<1x128xf32> -> vector<1x128xf32>
    %67 = arith.addf %65, %66 : vector<1x128xf32>
    %68 = arith.negf %67 : vector<1x128xf32>
    %69 = math.exp %68 : vector<1x128xf32>
    %cst_20 = arith.constant 1.000000e+00 : f32
    %70 = vector.broadcast %cst_20 : f32 to vector<1x128xf32>
    %71 = arith.addf %70, %69 : vector<1x128xf32>
    %72 = arith.divf %70, %71 : vector<1x128xf32>
    %73 = vector.extract_strided_slice %72 {offsets = [0, 64], sizes = [1, 32], strides = [1, 1]} : vector<1x128xf32> to vector<1x32xf32>
    %cst_21 = arith.constant 2.000000e+00 : f32
    %74 = vector.broadcast %cst_21 : f32 to vector<1x32xf32>
    %75 = arith.mulf %74, %73 : vector<1x32xf32>
    %cst_22 = arith.constant 1.000000e+00 : f32
    %76 = vector.broadcast %cst_22 : f32 to vector<1x32xf32>
    %77 = arith.subf %75, %76 : vector<1x32xf32>
    %78 = vector.extract_strided_slice %72 {offsets = [0, 32], sizes = [1, 32], strides = [1, 1]} : vector<1x128xf32> to vector<1x32xf32>
    %79 = arith.mulf %78, %61 : vector<1x32xf32>
    %80 = vector.extract_strided_slice %72 {offsets = [0, 0], sizes = [1, 32], strides = [1, 1]} : vector<1x128xf32> to vector<1x32xf32>
    %81 = arith.mulf %80, %77 : vector<1x32xf32>
    %82 = arith.addf %79, %81 : vector<1x32xf32>
    %83 = vector.extract_strided_slice %72 {offsets = [0, 96], sizes = [1, 32], strides = [1, 1]} : vector<1x128xf32> to vector<1x32xf32>
    %84 = math.tanh %82 : vector<1x32xf32>
    %85 = arith.mulf %83, %84 : vector<1x32xf32>
    %86 = vector.extract_strided_slice %27 {offsets = [3, 0], sizes = [1, 128], strides = [1, 1]} : vector<8x128xf32> to vector<1x128xf32>
    %cst_23 = arith.constant dense<0.000000e+00> : vector<1x128xf32>
    %87 = tpu.matmul %85, %1, %cst_23 {dimension_numbers = #tpu.dot_dimension_numbers<[1], [0], [0], [1], [0, 0, 1, 1], [], []>} : vector<1x32xf32>, vector<32x128xf32>, vector<1x128xf32> -> vector<1x128xf32>
    %88 = arith.addf %86, %87 : vector<1x128xf32>
    %89 = arith.negf %88 : vector<1x128xf32>
    %90 = math.exp %89 : vector<1x128xf32>
    %cst_24 = arith.constant 1.000000e+00 : f32
    %91 = vector.broadcast %cst_24 : f32 to vector<1x128xf32>
    %92 = arith.addf %91, %90 : vector<1x128xf32>
    %93 = arith.divf %91, %92 : vector<1x128xf32>
    %94 = vector.extract_strided_slice %93 {offsets = [0, 64], sizes = [1, 32], strides = [1, 1]} : vector<1x128xf32> to vector<1x32xf32>
    %cst_25 = arith.constant 2.000000e+00 : f32
    %95 = vector.broadcast %cst_25 : f32 to vector<1x32xf32>
    %96 = arith.mulf %95, %94 : vector<1x32xf32>
    %cst_26 = arith.constant 1.000000e+00 : f32
    %97 = vector.broadcast %cst_26 : f32 to vector<1x32xf32>
    %98 = arith.subf %96, %97 : vector<1x32xf32>
    %99 = vector.extract_strided_slice %93 {offsets = [0, 32], sizes = [1, 32], strides = [1, 1]} : vector<1x128xf32> to vector<1x32xf32>
    %100 = arith.mulf %99, %82 : vector<1x32xf32>
    %101 = vector.extract_strided_slice %93 {offsets = [0, 0], sizes = [1, 32], strides = [1, 1]} : vector<1x128xf32> to vector<1x32xf32>
    %102 = arith.mulf %101, %98 : vector<1x32xf32>
    %103 = arith.addf %100, %102 : vector<1x32xf32>
    %104 = vector.extract_strided_slice %93 {offsets = [0, 96], sizes = [1, 32], strides = [1, 1]} : vector<1x128xf32> to vector<1x32xf32>
    %105 = math.tanh %103 : vector<1x32xf32>
    %106 = arith.mulf %104, %105 : vector<1x32xf32>
    %107 = vector.extract_strided_slice %27 {offsets = [4, 0], sizes = [1, 128], strides = [1, 1]} : vector<8x128xf32> to vector<1x128xf32>
    %cst_27 = arith.constant dense<0.000000e+00> : vector<1x128xf32>
    %108 = tpu.matmul %106, %1, %cst_27 {dimension_numbers = #tpu.dot_dimension_numbers<[1], [0], [0], [1], [0, 0, 1, 1], [], []>} : vector<1x32xf32>, vector<32x128xf32>, vector<1x128xf32> -> vector<1x128xf32>
    %109 = arith.addf %107, %108 : vector<1x128xf32>
    %110 = arith.negf %109 : vector<1x128xf32>
    %111 = math.exp %110 : vector<1x128xf32>
    %cst_28 = arith.constant 1.000000e+00 : f32
    %112 = vector.broadcast %cst_28 : f32 to vector<1x128xf32>
    %113 = arith.addf %112, %111 : vector<1x128xf32>
    %114 = arith.divf %112, %113 : vector<1x128xf32>
    %115 = vector.extract_strided_slice %114 {offsets = [0, 64], sizes = [1, 32], strides = [1, 1]} : vector<1x128xf32> to vector<1x32xf32>
    %cst_29 = arith.constant 2.000000e+00 : f32
    %116 = vector.broadcast %cst_29 : f32 to vector<1x32xf32>
    %117 = arith.mulf %116, %115 : vector<1x32xf32>
    %cst_30 = arith.constant 1.000000e+00 : f32
    %118 = vector.broadcast %cst_30 : f32 to vector<1x32xf32>
    %119 = arith.subf %117, %118 : vector<1x32xf32>
    %120 = vector.extract_strided_slice %114 {offsets = [0, 32], sizes = [1, 32], strides = [1, 1]} : vector<1x128xf32> to vector<1x32xf32>
    %121 = arith.mulf %120, %103 : vector<1x32xf32>
    %122 = vector.extract_strided_slice %114 {offsets = [0, 0], sizes = [1, 32], strides = [1, 1]} : vector<1x128xf32> to vector<1x32xf32>
    %123 = arith.mulf %122, %119 : vector<1x32xf32>
    %124 = arith.addf %121, %123 : vector<1x32xf32>
    %125 = vector.extract_strided_slice %114 {offsets = [0, 96], sizes = [1, 32], strides = [1, 1]} : vector<1x128xf32> to vector<1x32xf32>
    %126 = math.tanh %124 : vector<1x32xf32>
    %127 = arith.mulf %125, %126 : vector<1x32xf32>
    %128 = vector.extract_strided_slice %27 {offsets = [5, 0], sizes = [1, 128], strides = [1, 1]} : vector<8x128xf32> to vector<1x128xf32>
    %cst_31 = arith.constant dense<0.000000e+00> : vector<1x128xf32>
    %129 = tpu.matmul %127, %1, %cst_31 {dimension_numbers = #tpu.dot_dimension_numbers<[1], [0], [0], [1], [0, 0, 1, 1], [], []>} : vector<1x32xf32>, vector<32x128xf32>, vector<1x128xf32> -> vector<1x128xf32>
    %130 = arith.addf %128, %129 : vector<1x128xf32>
    %131 = arith.negf %130 : vector<1x128xf32>
    %132 = math.exp %131 : vector<1x128xf32>
    %cst_32 = arith.constant 1.000000e+00 : f32
    %133 = vector.broadcast %cst_32 : f32 to vector<1x128xf32>
    %134 = arith.addf %133, %132 : vector<1x128xf32>
    %135 = arith.divf %133, %134 : vector<1x128xf32>
    %136 = vector.extract_strided_slice %135 {offsets = [0, 64], sizes = [1, 32], strides = [1, 1]} : vector<1x128xf32> to vector<1x32xf32>
    %cst_33 = arith.constant 2.000000e+00 : f32
    %137 = vector.broadcast %cst_33 : f32 to vector<1x32xf32>
    %138 = arith.mulf %137, %136 : vector<1x32xf32>
    %cst_34 = arith.constant 1.000000e+00 : f32
    %139 = vector.broadcast %cst_34 : f32 to vector<1x32xf32>
    %140 = arith.subf %138, %139 : vector<1x32xf32>
    %141 = vector.extract_strided_slice %135 {offsets = [0, 32], sizes = [1, 32], strides = [1, 1]} : vector<1x128xf32> to vector<1x32xf32>
    %142 = arith.mulf %141, %124 : vector<1x32xf32>
    %143 = vector.extract_strided_slice %135 {offsets = [0, 0], sizes = [1, 32], strides = [1, 1]} : vector<1x128xf32> to vector<1x32xf32>
    %144 = arith.mulf %143, %140 : vector<1x32xf32>
    %145 = arith.addf %142, %144 : vector<1x32xf32>
    %146 = vector.extract_strided_slice %135 {offsets = [0, 96], sizes = [1, 32], strides = [1, 1]} : vector<1x128xf32> to vector<1x32xf32>
    %147 = math.tanh %145 : vector<1x32xf32>
    %148 = arith.mulf %146, %147 : vector<1x32xf32>
    %149 = vector.extract_strided_slice %27 {offsets = [6, 0], sizes = [1, 128], strides = [1, 1]} : vector<8x128xf32> to vector<1x128xf32>
    %cst_35 = arith.constant dense<0.000000e+00> : vector<1x128xf32>
    %150 = tpu.matmul %148, %1, %cst_35 {dimension_numbers = #tpu.dot_dimension_numbers<[1], [0], [0], [1], [0, 0, 1, 1], [], []>} : vector<1x32xf32>, vector<32x128xf32>, vector<1x128xf32> -> vector<1x128xf32>
    %151 = arith.addf %149, %150 : vector<1x128xf32>
    %152 = arith.negf %151 : vector<1x128xf32>
    %153 = math.exp %152 : vector<1x128xf32>
    %cst_36 = arith.constant 1.000000e+00 : f32
    %154 = vector.broadcast %cst_36 : f32 to vector<1x128xf32>
    %155 = arith.addf %154, %153 : vector<1x128xf32>
    %156 = arith.divf %154, %155 : vector<1x128xf32>
    %157 = vector.extract_strided_slice %156 {offsets = [0, 64], sizes = [1, 32], strides = [1, 1]} : vector<1x128xf32> to vector<1x32xf32>
    %cst_37 = arith.constant 2.000000e+00 : f32
    %158 = vector.broadcast %cst_37 : f32 to vector<1x32xf32>
    %159 = arith.mulf %158, %157 : vector<1x32xf32>
    %cst_38 = arith.constant 1.000000e+00 : f32
    %160 = vector.broadcast %cst_38 : f32 to vector<1x32xf32>
    %161 = arith.subf %159, %160 : vector<1x32xf32>
    %162 = vector.extract_strided_slice %156 {offsets = [0, 32], sizes = [1, 32], strides = [1, 1]} : vector<1x128xf32> to vector<1x32xf32>
    %163 = arith.mulf %162, %145 : vector<1x32xf32>
    %164 = vector.extract_strided_slice %156 {offsets = [0, 0], sizes = [1, 32], strides = [1, 1]} : vector<1x128xf32> to vector<1x32xf32>
    %165 = arith.mulf %164, %161 : vector<1x32xf32>
    %166 = arith.addf %163, %165 : vector<1x32xf32>
    %167 = vector.extract_strided_slice %156 {offsets = [0, 96], sizes = [1, 32], strides = [1, 1]} : vector<1x128xf32> to vector<1x32xf32>
    %168 = math.tanh %166 : vector<1x32xf32>
    %169 = arith.mulf %167, %168 : vector<1x32xf32>
    %170 = vector.extract_strided_slice %27 {offsets = [7, 0], sizes = [1, 128], strides = [1, 1]} : vector<8x128xf32> to vector<1x128xf32>
    %cst_39 = arith.constant dense<0.000000e+00> : vector<1x128xf32>
    %171 = tpu.matmul %169, %1, %cst_39 {dimension_numbers = #tpu.dot_dimension_numbers<[1], [0], [0], [1], [0, 0, 1, 1], [], []>} : vector<1x32xf32>, vector<32x128xf32>, vector<1x128xf32> -> vector<1x128xf32>
    %172 = arith.addf %170, %171 : vector<1x128xf32>
    %173 = arith.negf %172 : vector<1x128xf32>
    %174 = math.exp %173 : vector<1x128xf32>
    %cst_40 = arith.constant 1.000000e+00 : f32
    %175 = vector.broadcast %cst_40 : f32 to vector<1x128xf32>
    %176 = arith.addf %175, %174 : vector<1x128xf32>
    %177 = arith.divf %175, %176 : vector<1x128xf32>
    %178 = vector.extract_strided_slice %177 {offsets = [0, 64], sizes = [1, 32], strides = [1, 1]} : vector<1x128xf32> to vector<1x32xf32>
    %cst_41 = arith.constant 2.000000e+00 : f32
    %179 = vector.broadcast %cst_41 : f32 to vector<1x32xf32>
    %180 = arith.mulf %179, %178 : vector<1x32xf32>
    %cst_42 = arith.constant 1.000000e+00 : f32
    %181 = vector.broadcast %cst_42 : f32 to vector<1x32xf32>
    %182 = arith.subf %180, %181 : vector<1x32xf32>
    %183 = vector.extract_strided_slice %177 {offsets = [0, 32], sizes = [1, 32], strides = [1, 1]} : vector<1x128xf32> to vector<1x32xf32>
    %184 = arith.mulf %183, %166 : vector<1x32xf32>
    %185 = vector.extract_strided_slice %177 {offsets = [0, 0], sizes = [1, 32], strides = [1, 1]} : vector<1x128xf32> to vector<1x32xf32>
    %186 = arith.mulf %185, %182 : vector<1x32xf32>
    %187 = arith.addf %184, %186 : vector<1x32xf32>
    %188 = vector.extract_strided_slice %177 {offsets = [0, 96], sizes = [1, 32], strides = [1, 1]} : vector<1x128xf32> to vector<1x32xf32>
    %189 = math.tanh %187 : vector<1x32xf32>
    %190 = arith.mulf %188, %189 : vector<1x32xf32>
    %191 = math.tanh %190 : vector<1x32xf32>
    %cst_43 = arith.constant dense<0.000000e+00> : vector<1x128xf32>
    %192 = tpu.matmul %191, %3, %cst_43 {dimension_numbers = #tpu.dot_dimension_numbers<[1], [0], [0], [1], [0, 0, 1, 1], [], []>} : vector<1x32xf32>, vector<32x128xf32>, vector<1x128xf32> -> vector<1x128xf32>
    %193 = arith.addf %192, %4 : vector<1x128xf32>
    %194 = arith.negf %193 : vector<1x128xf32>
    %195 = math.exp %194 : vector<1x128xf32>
    %cst_44 = arith.constant 1.000000e+00 : f32
    %196 = vector.broadcast %cst_44 : f32 to vector<1x128xf32>
    %197 = arith.addf %196, %195 : vector<1x128xf32>
    %198 = arith.divf %196, %197 : vector<1x128xf32>
    %199 = vector.extract_strided_slice %198 {offsets = [0, 64], sizes = [1, 32], strides = [1, 1]} : vector<1x128xf32> to vector<1x32xf32>
    %cst_45 = arith.constant 2.000000e+00 : f32
    %200 = vector.broadcast %cst_45 : f32 to vector<1x32xf32>
    %201 = arith.mulf %200, %199 : vector<1x32xf32>
    %cst_46 = arith.constant 1.000000e+00 : f32
    %202 = vector.broadcast %cst_46 : f32 to vector<1x32xf32>
    %203 = arith.subf %201, %202 : vector<1x32xf32>
    %204 = vector.extract_strided_slice %198 {offsets = [0, 96], sizes = [1, 32], strides = [1, 1]} : vector<1x128xf32> to vector<1x32xf32>
    %205 = vector.extract_strided_slice %198 {offsets = [0, 0], sizes = [1, 32], strides = [1, 1]} : vector<1x128xf32> to vector<1x32xf32>
    %206 = arith.mulf %205, %203 : vector<1x32xf32>
    %207 = math.tanh %206 : vector<1x32xf32>
    %208 = arith.mulf %204, %207 : vector<1x32xf32>
    %209 = math.tanh %208 : vector<1x32xf32>
    %cst_47 = arith.constant dense<0.000000e+00> : vector<1x128xf32>
    %210 = tpu.matmul %209, %5, %cst_47 {dimension_numbers = #tpu.dot_dimension_numbers<[1], [0], [0], [1], [0, 0, 1, 1], [], []>} : vector<1x32xf32>, vector<32x128xf32>, vector<1x128xf32> -> vector<1x128xf32>
    %211 = arith.addf %210, %6 : vector<1x128xf32>
    %212 = arith.negf %211 : vector<1x128xf32>
    %213 = math.exp %212 : vector<1x128xf32>
    %cst_48 = arith.constant 1.000000e+00 : f32
    %214 = vector.broadcast %cst_48 : f32 to vector<1x128xf32>
    %215 = arith.addf %214, %213 : vector<1x128xf32>
    %216 = arith.divf %214, %215 : vector<1x128xf32>
    %217 = vector.extract_strided_slice %216 {offsets = [0, 64], sizes = [1, 32], strides = [1, 1]} : vector<1x128xf32> to vector<1x32xf32>
    %cst_49 = arith.constant 2.000000e+00 : f32
    %218 = vector.broadcast %cst_49 : f32 to vector<1x32xf32>
    %219 = arith.mulf %218, %217 : vector<1x32xf32>
    %cst_50 = arith.constant 1.000000e+00 : f32
    %220 = vector.broadcast %cst_50 : f32 to vector<1x32xf32>
    %221 = arith.subf %219, %220 : vector<1x32xf32>
    %222 = vector.extract_strided_slice %216 {offsets = [0, 96], sizes = [1, 32], strides = [1, 1]} : vector<1x128xf32> to vector<1x32xf32>
    %223 = vector.extract_strided_slice %216 {offsets = [0, 0], sizes = [1, 32], strides = [1, 1]} : vector<1x128xf32> to vector<1x32xf32>
    %224 = arith.mulf %223, %221 : vector<1x32xf32>
    %225 = math.tanh %224 : vector<1x32xf32>
    %226 = arith.mulf %222, %225 : vector<1x32xf32>
    %227 = arith.mulf %226, %7 : vector<1x32xf32>
    %cst_51 = arith.constant dense<0.000000e+00> : vector<1xf32>
    %228 = vector.multi_reduction <add>, %227, %cst_51 [1] : vector<1x32xf32> to vector<1xf32>
    %229 = vector.shape_cast %228 : vector<1xf32> to vector<1x1xf32>
    %230 = arith.addf %229, %8 : vector<1x1xf32>
    %231 = arith.negf %230 : vector<1x1xf32>
    %232 = math.exp %231 : vector<1x1xf32>
    %cst_52 = arith.constant 1.000000e+00 : f32
    %233 = vector.broadcast %cst_52 : f32 to vector<1x1xf32>
    %234 = arith.addf %233, %232 : vector<1x1xf32>
    %235 = arith.divf %233, %234 : vector<1x1xf32>
    %c0_53 = arith.constant 0 : index
    %c0_54 = arith.constant 0 : index
    %236 = vector.load %arg2[%c0_53, %c0_54] : memref<1x1xf32, #tpu.memory_space<vmem>>, vector<1x1xf32>
    tpu.vector_store %arg2[%c0_53, %c0_54], %235 {strides = array<i32>} : memref<1x1xf32, #tpu.memory_space<vmem>>, vector<1x1xf32>,
    return
  }
}

</mosaic_0001>

<bundles_post_ra>
// kernel: tpu_custom_call.1
= control target key start
LH: loop header
LB: loop body
LE: loop exit
PB: predicated region body
PF: predicated region fallthrough
CT: control target
= control target key end

     0   :  { %7 = vsyncpa [#allocation3], 0  ;;  %s1577_s0 = inlined_call_operand.vmem [shape: f32[8,3], index: 0, kind: input, shape index: {}]   ;;  %s1578_s1 = inlined_call_operand.hbm [shape: f32[144,128], index: 1, kind: input, shape index: {}]   ;;  %s1579_s2 = inlined_call_operand.hbm [shape: f32[1,1], index: 2, kind: output, shape index: {}]  }
   0x1   :  { %8 = vsyncpa [#allocation4], 0  ;;  %s1393_s9 = smov [#allocation2]  }
   0x2   :  { %s16_s10 = sshll.u32 %s1393_s9, 4  ;;  %s17_s10 = int_to_ptr.vmem [resolvable:$true] %s16_s10 }
   0x3   :  { %s1357_s11 = scalar_lea.vmem %s17_s10, 2304  ;;  %p1362_p1 = scmp.lt.s32.totalorder %s17_s10, %s17_s10 }
   0x4   :  { %p1358_p0 = scmp.ne.s32.totalorder %s17_s10, %s1357_s11  ;;  %p1363_p2 = scmp.lt.s32.totalorder %s1357_s11, %s1357_s11 }
   0x6   :  { %p1364_p3 = por %p1363_p2, %p1362_p1 }
   0x8   :  { %p1365_p4 = pnand %p1364_p3, %p1358_p0 }
   0xa   :  { %1368 = shalt.err (!%p1365_p4)
}
   0xb   :  { %s1394_s12 = smov 128   ;;  %s1395_s13 = smov 8  }
   0xc   :  { %22 = dma.hbm_to_vmem [thread:$0]  %s1578_s1, 2304, %s17_s10, [#allocation3], %s1394_s12, %s1394_s12, %s1395_s13  }
   0xd   :  { %1389 = dma.done.wait [#allocation3], 2304  }
   0xe   :  { %1390 = vsyncadd [#allocation3], 4294964992  ;;  %v1396_v0 = vmov 0   ;;  %v1397_v1 = vmov 2   ;;  %v26_v2 = vld [vmem:[%s1577_s0] sm:$0xff]  ;;  %v1398_v3 = vmov 1  }
   0xf   :  { %1277 = vset.pattern.permute.xlu0 %v1396_v0  ;;  %1279 = vset.pattern.permute.xlu1 %v1397_v1  ;;  %v1087_v4 = vld [vmem:[#allocation2] ss:$0 sm:$0xff]  ;;  %v1088_v7 = vld [vmem:[#allocation2 + $0x28] ss:$0 sm:$0xff]  ;;  %v1089_v8 = vld [vmem:[#allocation2 + $0x1] ss:$0 sm:$0xff] }
  0x10   :  { %47 = vperm.xlu0 %1277, %v26_v2   ;;  %73 = vperm.xlu1 %1279, %v26_v2   ;;  %v1090_v9 = vld [vmem:[#allocation2 + $0x2] ss:$0 sm:$0xff]  ;;  %s1399_s0 = smov 64   ;;  %v1400_v26 = vmov 0.0   ;;  %v1433_v27 = vld [vmem:[#allocation2 + $0x18] sm:$0xff]  ;;  %vm1401_vm0 = vmmov 0  }
  0x11   :  { %v1430_v25 = vld [vmem:[#allocation2 + $0x20] sm:$0xff]  ;;  %1166 = vmatprep.subr.mxu0 %v1400_v26  ;;  %1174 = vmatprep.mubr.msk.f32.mxu0 %vm1401_vm0, %v1400_v26  ;;  %v1440_v28 = vld [vmem:[#allocation2 + $0x10] sm:$0xff]  ;;  %v1446_v29 = vld [vmem:[#allocation2 + $0x8] sm:$0xff]  ;;  %s1402_s1 = smov 96   ;;  %s1403_s18 = smov 32   ;;  %vm104_vm1 = vcmask 261120  }
  0x12   :  { %1167 = vmatpush3.msra.mxu0 %v1430_v25  ;;  %1177 = vmatprep.subr.mxu1 %v1400_v26  ;;  %vm1059_vm2 = vcmask 253952   ;;  %s1404_s19 = smov [#allocation5]   ;;  %vm1070_vm3 = vcmask 0  }
  0x13   :  { %1168 = vmatprep.subr.mxu0 %v1400_v26  ;;  %1178 = vmatpush3.msra.mxu1 %v1430_v25  ;;  %s1078_s20 = sshll.u32 %s1404_s19, 4  ;;  %s1079_s20 = int_to_ptr.vmem [resolvable:$true] %s1078_s20 }
  0x14   :  { %1278 = vset.pattern.permute.xlu0 %v1398_v3  ;;  %1169 = vmatpush3.msra.mxu0 %v1433_v27  ;;  %s1369_s21 = scalar_lea.vmem %s1079_s20, 16  ;;  %s1373_s22 = scalar_lea.vmem %s1079_s20, 32 }
  0x15   :  { %62 = vperm.xlu0 %1278, %v26_v2   ;;  %1179 = vmatprep.subr.mxu1 %v1400_v26  ;;  %p1370_p5 = scmp.ne.s32.totalorder %s1079_s20, %s1369_s21  ;;  %p1374_p6 = scmp.lt.s32.totalorder %s1079_s20, %s1079_s20 }
  0x16   :  { %1170 = vmatprep.subr.mxu0 %v1400_v26  ;;  %1180 = vmatpush3.msra.mxu1 %v1433_v27  ;;  %p1375_p7 = scmp.lt.s32.totalorder %s1373_s22, %s1369_s21 }
  0x17   :  { %1171 = vmatpush3.msra.mxu0 %v1440_v28  ;;  %1181 = vmatprep.subr.mxu1 %v1400_v26 }
  0x18   :  { %1172 = vmatprep.subr.mxu0 %v1400_v26  ;;  %1182 = vmatpush3.msra.mxu1 %v1440_v28  ;;  %p1376_p8 = por %p1375_p7, %p1374_p6 }
  0x19   :  { %1280 = vset.pattern.permute.xlu0 %v1397_v1  ;;  %1173 = vmatpush3.msra.mxu0 %v1446_v29 }
  0x1a   :  { %1183 = vmatprep.subr.mxu1 %v1400_v26  ;;  %1185 = vmatprep.mubr.msk.f32.mxu1 %vm1401_vm0, %v1400_v26  ;;  %p1377_p9 = pnand %p1376_p8, %p1370_p5 }
  0x1b   :  { %1184 = vmatpush3.msra.mxu1 %v1446_v29  ;;  %1188 = vmatprep.subr.mxu0 %v1400_v26 }
  0x1c   :  { %1199 = vmatprep.subr.mxu1 %v1400_v26 }
  0x8b   :  { %v48_v5 = vpop.permute.xlu0 %47  ;;  %v74_v10 = vpop.permute.xlu1 %73 }
  0x8c   :  { %v54_v6 = vmul.f32 %v1087_v4, %v48_v5  ;;  %v80_v14 = vmul.f32 %v1090_v9, %v74_v10 }
  0x8e   :  { %v59_v12 = vadd.f32 %v1088_v7, %v54_v6 }
  0x90   :  { %v63_v11 = vpop.permute.xlu0 %62 }
  0x91   :  { %v69_v13 = vmul.f32 %v1089_v8, %v63_v11 }
  0x93   :  { %v70_v15 = vadd.f32 %v69_v13, %v59_v12 }
  0x95   :  { %v1426_v16 = vadd.f32 %v80_v14, %v70_v15 }
  0x97   :  { %v1091_v17 = vmul.f32 -1.442695, %v1426_v16 }
  0x99   :  { %1281 = vpow2.f32 %v1091_v17 }
  0xa6   :  { %v1282_v18 = vpop.eup %1281 }
  0xa7   :  { %v85_v19 = vadd.f32 1.0, %v1282_v18 }
  0xa9   :  { %1283 = vrcp.f32 %v85_v19 }
  0xb6   :  { %v1284_v20 = vpop.eup %1283 }
  0xb7   :  { %v88_v21 = vmul.f32 2.0, %v1284_v20 }
  0xb9   :  { %v1092_v22 = vadd.f32 -1.0, %v88_v21 }
  0xbb   :  { %91 = vrot.lane.b32.xlu1 %v1092_v22, %s1399_s0 }
 0x12d   :  { %v92_v23 = vpop.permute.xlu1 %91 }
 0x12e   :  { %v94_v24 = vmul.f32 %v1284_v20, %v92_v23 }
 0x130   :  { %1285 = vtanh.f32 %v94_v24  ;;  %v190_v33 = vrot.slane %v94_v24, 7 }
 0x13d   :  { %v1286_v30 = vpop.eup %1285 }
 0x13e   :  { %97 = vrot.lane.b32.xlu1 %v1286_v30, %s1402_s1 }
 0x1b0   :  { %v98_v31 = vpop.permute.xlu1 %97 }
 0x1b1   :  { %v100_v32 = vmul.f32 %v1284_v20, %v98_v31 }
 0x1b3   :  { %102 = vrot.lane.b32.xlu0 %v100_v32, %s1403_s18 }
 0x1b7   :  { %191 = vrot.lane.b32.xlu0 %v190_v33, %s1403_s18 }
 0x225   :  { %v103_v34 = vpop.permute.xlu0 %102 }
 0x226   :  { %1175 = vmatmul.mubr.msk.f32.vlgmr.msra.gmra.mxu0 %vm104_vm1, %v103_v34 }
 0x227   :  { %1189 = vmatpush3.msra.mxu0 %v1430_v25  ;;  %1196 = vmatprep.mubr.msk.f32.mxu0 %vm1401_vm0, %v1400_v26 }
 0x228   :  { %1190 = vmatprep.subr.mxu0 %v1400_v26 }
 0x229   :  { %1191 = vmatpush3.msra.mxu0 %v1433_v27  ;;  %v192_v47 = vpop.permute.xlu0 %191 }
 0x22a   :  { %1192 = vmatprep.subr.mxu0 %v1400_v26 }
 0x22b   :  { %1193 = vmatpush3.msra.mxu0 %v1440_v28 }
 0x22c   :  { %1194 = vmatprep.subr.mxu0 %v1400_v26 }
 0x22d   :  { %1195 = vmatpush3.msra.mxu0 %v1446_v29 }
 0x22e   :  { %1210 = vmatprep.subr.mxu0 %v1400_v26 }
 0x2e6   :  { %v173_v35 = vpop.f32.mrf.mxu0 }
 0x2e7   :  { %v178_v36 = vrot.slane %v173_v35, 7 }
 0x2e8   :  { %v1176_v37 = vpop.f32.mrf.mxu0 }
 0x2e9   :  { %v180_v38 = vadd.f32 %v178_v36, %v1426_v16 }
 0x2eb   :  { %v1094_v39 = vmul.f32 -1.442695, %v180_v38 }
 0x2ed   :  { %1287 = vpow2.f32 %v1094_v39 }
 0x2fa   :  { %v1288_v40 = vpop.eup %1287 }
 0x2fb   :  { %v184_v41 = vadd.f32 1.0, %v1288_v40 }
 0x2fd   :  { %1289 = vrcp.f32 %v184_v41 }
 0x30a   :  { %v1290_v42 = vpop.eup %1289 }
 0x30b   :  { %v187_v43 = vmul.f32 2.0, %v1290_v42  ;;  %v194_v48 = vmul.f32 %v1290_v42, %v192_v47 }
 0x30d   :  { %v1095_v44 = vadd.f32 -1.0, %v187_v43 }
 0x30f   :  { %196 = vrot.lane.b32.xlu1 %v1095_v44, %s1399_s0 }
 0x381   :  { %v197_v45 = vpop.permute.xlu1 %196 }
 0x382   :  { %v199_v46 = vmul.f32 %v1290_v42, %v197_v45 }
 0x384   :  { %201 = vrot.lane.b32.xlu1 %v199_v46, %s1403_s18 }
 0x3f6   :  { %v202_v49 = vpop.permute.xlu1 %201 }
 0x3f7   :  { %v204_v50 = vadd.f32 %v202_v49, %v194_v48 }
 0x3f9   :  { %1291 = vtanh.f32 %v204_v50  ;;  %v300_v4 = vrot.slane %v204_v50, 7 }
 0x406   :  { %v1292_v51 = vpop.eup %1291 }
 0x407   :  { %207 = vrot.lane.b32.xlu0 %v1292_v51, %s1399_s0 }
 0x479   :  { %v208_v52 = vpop.permute.xlu0 %207 }
 0x47a   :  { %v210_v53 = vmul.f32 %v1290_v42, %v208_v52 }
 0x47c   :  { %v212_v54 = vrot.slane %v210_v53, 1 }
 0x47e   :  { %213 = vrot.lane.b32.xlu1 %v212_v54, %s1403_s18 }
 0x4f0   :  { %v214_v55 = vpop.permute.xlu1 %213 }
 0x4f1   :  { %1186 = vmatmul.mubr.msk.f32.vlgmr.msra.gmra.mxu1 %vm104_vm1, %v214_v55 }
 0x4f2   :  { %1200 = vmatpush3.msra.mxu1 %v1430_v25  ;;  %1207 = vmatprep.mubr.msk.f32.mxu1 %vm1401_vm0, %v1400_v26 }
 0x4f3   :  { %1201 = vmatprep.subr.mxu1 %v1400_v26 }
 0x4f4   :  { %1202 = vmatpush3.msra.mxu1 %v1433_v27 }
 0x4f5   :  { %1203 = vmatprep.subr.mxu1 %v1400_v26 }
 0x4f6   :  { %1204 = vmatpush3.msra.mxu1 %v1440_v28 }
 0x4f7   :  { %1205 = vmatprep.subr.mxu1 %v1400_v26 }
 0x4f8   :  { %1206 = vmatpush3.msra.mxu1 %v1446_v29 }
 0x4f9   :  { %1221 = vmatprep.subr.mxu1 %v1400_v26 }
 0x5b1   :  { %v283_v56 = vpop.f32.mrf.mxu1 }
 0x5b2   :  { %v288_v57 = vrot.slane %v283_v56, 6 }
 0x5b3   :  { %v1187_v58 = vpop.f32.mrf.mxu1 }
 0x5b4   :  { %v290_v59 = vadd.f32 %v288_v57, %v1426_v16 }
 0x5b6   :  { %v1097_v60 = vmul.f32 -1.442695, %v290_v59 }
 0x5b8   :  { %1293 = vpow2.f32 %v1097_v60 }
 0x5c5   :  { %v1294_v61 = vpop.eup %1293 }
 0x5c6   :  { %v294_v62 = vadd.f32 1.0, %v1294_v61 }
 0x5c8   :  { %1295 = vrcp.f32 %v294_v62 }
 0x5d5   :  { %v1296_v63 = vpop.eup %1295 }
 0x5d6   :  { %v297_v0 = vmul.f32 2.0, %v1296_v63  ;;  %v302_v5 = vmul.f32 %v1296_v63, %v300_v4 }
 0x5d8   :  { %v1098_v1 = vadd.f32 -1.0, %v297_v0 }
 0x5da   :  { %304 = vrot.lane.b32.xlu0 %v1098_v1, %s1399_s0 }
 0x64c   :  { %v305_v2 = vpop.permute.xlu0 %304 }
 0x64d   :  { %v307_v3 = vmul.f32 %v1296_v63, %v305_v2 }
 0x64f   :  { %309 = vrot.lane.b32.xlu1 %v307_v3, %s1403_s18 }
 0x6c1   :  { %v310_v6 = vpop.permute.xlu1 %309 }
 0x6c2   :  { %v312_v7 = vadd.f32 %v310_v6, %v302_v5 }
 0x6c4   :  { %1297 = vtanh.f32 %v312_v7  ;;  %v408_v31 = vrot.slane %v312_v7, 7 }
 0x6d1   :  { %v1298_v8 = vpop.eup %1297 }
 0x6d2   :  { %315 = vrot.lane.b32.xlu0 %v1298_v8, %s1399_s0 }
 0x744   :  { %v316_v9 = vpop.permute.xlu0 %315 }
 0x745   :  { %v318_v10 = vmul.f32 %v1296_v63, %v316_v9 }
 0x747   :  { %v320_v11 = vrot.slane %v318_v10, 2 }
 0x749   :  { %321 = vrot.lane.b32.xlu1 %v320_v11, %s1403_s18 }
 0x7bb   :  { %v322_v12 = vpop.permute.xlu1 %321 }
 0x7bc   :  { %1197 = vmatmul.mubr.msk.f32.vlgmr.msra.gmra.mxu0 %vm104_vm1, %v322_v12 }
 0x7bd   :  { %1211 = vmatpush3.msra.mxu0 %v1430_v25  ;;  %1218 = vmatprep.mubr.msk.f32.mxu0 %vm1401_vm0, %v1400_v26 }
 0x7be   :  { %1212 = vmatprep.subr.mxu0 %v1400_v26 }
 0x7bf   :  { %1213 = vmatpush3.msra.mxu0 %v1433_v27 }
 0x7c0   :  { %1214 = vmatprep.subr.mxu0 %v1400_v26 }
 0x7c1   :  { %1215 = vmatpush3.msra.mxu0 %v1440_v28 }
 0x7c2   :  { %1216 = vmatprep.subr.mxu0 %v1400_v26 }
 0x7c3   :  { %1217 = vmatpush3.msra.mxu0 %v1446_v29 }
 0x7c4   :  { %1232 = vmatprep.subr.mxu0 %v1400_v26 }
 0x87c   :  { %v391_v13 = vpop.f32.mrf.mxu0 }
 0x87d   :  { %v396_v14 = vrot.slane %v391_v13, 5 }
 0x87e   :  { %v1198_v15 = vpop.f32.mrf.mxu0 }
 0x87f   :  { %v398_v17 = vadd.f32 %v396_v14, %v1426_v16 }
 0x881   :  { %v1100_v18 = vmul.f32 -1.442695, %v398_v17 }
 0x883   :  { %1299 = vpow2.f32 %v1100_v18 }
 0x890   :  { %v1300_v19 = vpop.eup %1299 }
 0x891   :  { %v402_v20 = vadd.f32 1.0, %v1300_v19 }
 0x893   :  { %1301 = vrcp.f32 %v402_v20 }
 0x8a0   :  { %v1302_v21 = vpop.eup %1301 }
 0x8a1   :  { %v405_v22 = vmul.f32 2.0, %v1302_v21  ;;  %v410_v32 = vmul.f32 %v1302_v21, %v408_v31 }
 0x8a3   :  { %v1101_v23 = vadd.f32 -1.0, %v405_v22 }
 0x8a5   :  { %412 = vrot.lane.b32.xlu0 %v1101_v23, %s1399_s0 }
 0x917   :  { %v413_v24 = vpop.permute.xlu0 %412 }
 0x918   :  { %v415_v30 = vmul.f32 %v1302_v21, %v413_v24 }
 0x91a   :  { %417 = vrot.lane.b32.xlu1 %v415_v30, %s1403_s18 }
 0x98c   :  { %v418_v33 = vpop.permute.xlu1 %417 }
 0x98d   :  { %v420_v34 = vadd.f32 %v418_v33, %v410_v32 }
 0x98f   :  { %1303 = vtanh.f32 %v420_v34  ;;  %v516_v52 = vrot.slane %v420_v34, 7 }
 0x99c   :  { %v1304_v35 = vpop.eup %1303 }
 0x99d   :  { %423 = vrot.lane.b32.xlu0 %v1304_v35, %s1399_s0 }
 0xa0f   :  { %v424_v36 = vpop.permute.xlu0 %423 }
 0xa10   :  { %v426_v37 = vmul.f32 %v1302_v21, %v424_v36 }
 0xa12   :  { %v428_v38 = vrot.slane %v426_v37, 3 }
 0xa14   :  { %429 = vrot.lane.b32.xlu1 %v428_v38, %s1403_s18 }
 0xa86   :  { %v430_v39 = vpop.permute.xlu1 %429 }
 0xa87   :  { %1208 = vmatmul.mubr.msk.f32.vlgmr.msra.gmra.mxu1 %vm104_vm1, %v430_v39 }
 0xa88   :  { %1222 = vmatpush3.msra.mxu1 %v1430_v25  ;;  %1229 = vmatprep.mubr.msk.f32.mxu1 %vm1401_vm0, %v1400_v26 }
 0xa89   :  { %1223 = vmatprep.subr.mxu1 %v1400_v26 }
 0xa8a   :  { %1224 = vmatpush3.msra.mxu1 %v1433_v27 }
 0xa8b   :  { %1225 = vmatprep.subr.mxu1 %v1400_v26 }
 0xa8c   :  { %1226 = vmatpush3.msra.mxu1 %v1440_v28 }
 0xa8d   :  { %1227 = vmatprep.subr.mxu1 %v1400_v26 }
 0xa8e   :  { %1228 = vmatpush3.msra.mxu1 %v1446_v29 }
 0xa8f   :  { %1243 = vmatprep.subr.mxu1 %v1400_v26 }
 0xb47   :  { %v499_v40 = vpop.f32.mrf.mxu1 }
 0xb48   :  { %v504_v41 = vrot.slane %v499_v40, 4 }
 0xb49   :  { %v1209_v42 = vpop.f32.mrf.mxu1 }
 0xb4a   :  { %v506_v43 = vadd.f32 %v504_v41, %v1426_v16 }
 0xb4c   :  { %v1103_v44 = vmul.f32 -1.442695, %v506_v43 }
 0xb4e   :  { %1305 = vpow2.f32 %v1103_v44 }
 0xb5b   :  { %v1306_v45 = vpop.eup %1305 }
 0xb5c   :  { %v510_v46 = vadd.f32 1.0, %v1306_v45 }
 0xb5e   :  { %1307 = vrcp.f32 %v510_v46 }
 0xb6b   :  { %v1308_v47 = vpop.eup %1307 }
 0xb6c   :  { %v513_v48 = vmul.f32 2.0, %v1308_v47  ;;  %v518_v53 = vmul.f32 %v1308_v47, %v516_v52 }
 0xb6e   :  { %v1104_v49 = vadd.f32 -1.0, %v513_v48 }
 0xb70   :  { %520 = vrot.lane.b32.xlu0 %v1104_v49, %s1399_s0 }
 0xbe2   :  { %v521_v50 = vpop.permute.xlu0 %520 }
 0xbe3   :  { %v523_v51 = vmul.f32 %v1308_v47, %v521_v50 }
 0xbe5   :  { %525 = vrot.lane.b32.xlu1 %v523_v51, %s1403_s18 }
 0xc57   :  { %v526_v54 = vpop.permute.xlu1 %525 }
 0xc58   :  { %v528_v55 = vadd.f32 %v526_v54, %v518_v53 }
 0xc5a   :  { %1309 = vtanh.f32 %v528_v55 }
 0xc67   :  { %v1310_v56 = vpop.eup %1309 }
 0xc68   :  { %531 = vrot.lane.b32.xlu0 %v1310_v56, %s1399_s0 }
 0xcda   :  { %v532_v57 = vpop.permute.xlu0 %531 }
 0xcdb   :  { %v534_v58 = vmul.f32 %v1308_v47, %v532_v57  ;;  %v35_v57 = vld [vmem:[#allocation2 + $0x48] sm:$0xff] }
 0xcdd   :  { %v536_v59 = vrot.slane %v534_v58, 4  ;;  %v34_v58 = vld [vmem:[#allocation2 + $0x40] sm:$0xff] }
 0xcdf   :  { %537 = vrot.lane.b32.xlu1 %v536_v59, %s1403_s18  ;;  %v33_v59 = vld [vmem:[#allocation2 + $0x38] sm:$0xff] }
 0xd51   :  { %v538_v60 = vpop.permute.xlu1 %537 }
 0xd52   :  { %1219 = vmatmul.mubr.msk.f32.vlgmr.msra.gmra.mxu0 %vm104_vm1, %v538_v60  ;;  %v32_v60 = vld [vmem:[#allocation2 + $0x30] sm:$0xff] }
 0xd53   :  { %1233 = vmatpush3.msra.mxu0 %v1430_v25  ;;  %1240 = vmatprep.mubr.msk.f32.mxu0 %vm1401_vm0, %v1400_v26 }
 0xd54   :  { %1234 = vmatprep.subr.mxu0 %v1400_v26 }
 0xd55   :  { %1235 = vmatpush3.msra.mxu0 %v1433_v27 }
 0xd56   :  { %1236 = vmatprep.subr.mxu0 %v1400_v26 }
 0xd57   :  { %1237 = vmatpush3.msra.mxu0 %v1440_v28 }
 0xd58   :  { %1238 = vmatprep.subr.mxu0 %v1400_v26 }
 0xd59   :  { %1239 = vmatpush3.msra.mxu0 %v1446_v29  ;;  %v624_v29 = vrot.slane %v528_v55, 7 }
 0xd5a   :  { %1254 = vmatprep.subr.mxu0 %v1400_v26 }
 0xe12   :  { %v607_v61 = vpop.f32.mrf.mxu0 }
 0xe13   :  { %v612_v62 = vrot.slane %v607_v61, 3 }
 0xe14   :  { %v1220_v25 = vpop.f32.mrf.mxu0 }
 0xe15   :  { %v614_v63 = vadd.f32 %v612_v62, %v1426_v16 }
 0xe17   :  { %v1106_v0 = vmul.f32 -1.442695, %v614_v63 }
 0xe19   :  { %1311 = vpow2.f32 %v1106_v0 }
 0xe26   :  { %v1312_v1 = vpop.eup %1311 }
 0xe27   :  { %v618_v2 = vadd.f32 1.0, %v1312_v1  ;;  %v36_v1 = vld [vmem:[#allocation2 + $0x50] sm:$0x1] }
 0xe29   :  { %1313 = vrcp.f32 %v618_v2 }
 0xe36   :  { %v1314_v27 = vpop.eup %1313 }
 0xe37   :  { %v621_v3 = vmul.f32 2.0, %v1314_v27  ;;  %v626_v6 = vmul.f32 %v1314_v27, %v624_v29 }
 0xe39   :  { %v1107_v4 = vadd.f32 -1.0, %v621_v3 }
 0xe3b   :  { %628 = vrot.lane.b32.xlu0 %v1107_v4, %s1399_s0 }
 0xead   :  { %v629_v28 = vpop.permute.xlu0 %628 }
 0xeae   :  { %v631_v5 = vmul.f32 %v1314_v27, %v629_v28 }
 0xeb0   :  { %633 = vrot.lane.b32.xlu1 %v631_v5, %s1403_s18 }
 0xf22   :  { %v634_v7 = vpop.permute.xlu1 %633 }
 0xf23   :  { %v636_v8 = vadd.f32 %v634_v7, %v626_v6 }
 0xf25   :  { %1315 = vtanh.f32 %v636_v8  ;;  %v732_v32 = vrot.slane %v636_v8, 7 }
 0xf32   :  { %v1316_v9 = vpop.eup %1315 }
 0xf33   :  { %639 = vrot.lane.b32.xlu0 %v1316_v9, %s1399_s0 }
 0xfa5   :  { %v640_v10 = vpop.permute.xlu0 %639 }
 0xfa6   :  { %v642_v11 = vmul.f32 %v1314_v27, %v640_v10 }
 0xfa8   :  { %v644_v12 = vrot.slane %v642_v11, 5  ;;  %v40_v11 = vld [vmem:[#allocation2 + $0x70] sm:$0xff] }
 0xfaa   :  { %645 = vrot.lane.b32.xlu1 %v644_v12, %s1403_s18  ;;  %v39_v12 = vld [vmem:[#allocation2 + $0x68] sm:$0xff] }
0x101c   :  { %v646_v13 = vpop.permute.xlu1 %645 }
0x101d   :  { %1230 = vmatmul.mubr.msk.f32.vlgmr.msra.gmra.mxu1 %vm104_vm1, %v646_v13  ;;  %v38_v13 = vld [vmem:[#allocation2 + $0x60] sm:$0xff] }
0x101e   :  { %1251 = vmatprep.mubr.msk.f32.mxu1 %vm1401_vm0, %v1400_v26  ;;  %1244 = vmatpush3.msra.mxu1 %v35_v57 }
0x101f   :  { %1245 = vmatprep.subr.mxu1 %v1400_v26 }
0x1020   :  { %1246 = vmatpush3.msra.mxu1 %v34_v58 }
0x1021   :  { %1247 = vmatprep.subr.mxu1 %v1400_v26 }
0x1022   :  { %1248 = vmatpush3.msra.mxu1 %v33_v59 }
0x1023   :  { %1249 = vmatprep.subr.mxu1 %v1400_v26 }
0x1024   :  { %1250 = vmatpush3.msra.mxu1 %v32_v60 }
0x10dd   :  { %v715_v14 = vpop.f32.mrf.mxu1 }
0x10de   :  { %v720_v15 = vrot.slane %v715_v14, 2  ;;  %v37_v14 = vld [vmem:[#allocation2 + $0x58] sm:$0xff] }
0x10df   :  { %v1231_v17 = vpop.f32.mrf.mxu1 }
0x10e0   :  { %v722_v18 = vadd.f32 %v720_v15, %v1426_v16 }
0x10e2   :  { %v1109_v19 = vmul.f32 -1.442695, %v722_v18 }
0x10e4   :  { %1317 = vpow2.f32 %v1109_v19 }
0x10f1   :  { %v1318_v20 = vpop.eup %1317 }
0x10f2   :  { %v726_v21 = vadd.f32 1.0, %v1318_v20  ;;  %v41_v20 = vld [vmem:[#allocation2 + $0x78] sm:$0x1] }
0x10f4   :  { %1319 = vrcp.f32 %v726_v21 }
0x1101   :  { %v1320_v22 = vpop.eup %1319 }
0x1102   :  { %v729_v23 = vmul.f32 2.0, %v1320_v22  ;;  %v734_v33 = vmul.f32 %v1320_v22, %v732_v32 }
0x1104   :  { %v1110_v24 = vadd.f32 -1.0, %v729_v23 }
0x1106   :  { %736 = vrot.lane.b32.xlu0 %v1110_v24, %s1399_s0 }
0x1178   :  { %v737_v30 = vpop.permute.xlu0 %736 }
0x1179   :  { %v739_v31 = vmul.f32 %v1320_v22, %v737_v30 }
0x117b   :  { %741 = vrot.lane.b32.xlu1 %v739_v31, %s1403_s18 }
0x11ed   :  { %v742_v34 = vpop.permute.xlu1 %741 }
0x11ee   :  { %v744_v35 = vadd.f32 %v742_v34, %v734_v33  ;;  %v42_v34 = vld [vmem:[#allocation2 + $0x80] sm:$0x1] }
0x11f0   :  { %1321 = vtanh.f32 %v744_v35  ;;  %v840_v53 = vrot.slane %v744_v35, 7 }
0x11fd   :  { %v1322_v36 = vpop.eup %1321 }
0x11fe   :  { %747 = vrot.lane.b32.xlu0 %v1322_v36, %s1399_s0 }
0x1270   :  { %v748_v37 = vpop.permute.xlu0 %747 }
0x1271   :  { %v750_v38 = vmul.f32 %v1320_v22, %v748_v37 }
0x1273   :  { %v752_v39 = vrot.slane %v750_v38, 6 }
0x1275   :  { %753 = vrot.lane.b32.xlu1 %v752_v39, %s1403_s18 }
0x12e7   :  { %v754_v40 = vpop.permute.xlu1 %753 }
0x12e8   :  { %1241 = vmatmul.mubr.msk.f32.vlgmr.msra.gmra.mxu0 %vm104_vm1, %v754_v40 }
0x12e9   :  { %1262 = vmatprep.mubr.msk.f32.mxu0 %vm1401_vm0, %v1400_v26  ;;  %1255 = vmatpush3.msra.mxu0 %v40_v11 }
0x12ea   :  { %1256 = vmatprep.subr.mxu0 %v1400_v26 }
0x12eb   :  { %1257 = vmatpush3.msra.mxu0 %v39_v12 }
0x12ec   :  { %1258 = vmatprep.subr.mxu0 %v1400_v26 }
0x12ed   :  { %1259 = vmatpush3.msra.mxu0 %v38_v13 }
0x12ee   :  { %1260 = vmatprep.subr.mxu0 %v1400_v26 }
0x12ef   :  { %1261 = vmatpush3.msra.mxu0 %v37_v14 }
0x13a8   :  { %v823_v41 = vpop.f32.mrf.mxu0 }
0x13a9   :  { %v828_v42 = vrot.slane %v823_v41, 1 }
0x13aa   :  { %v1242_v43 = vpop.f32.mrf.mxu0 }
0x13ab   :  { %v830_v44 = vadd.f32 %v828_v42, %v1426_v16 }
0x13ad   :  { %v1112_v45 = vmul.f32 -1.442695, %v830_v44  ;;  %v43_v44 = vld [vmem:[#allocation2 + $0x88] sm:$0x1] }
0x13af   :  { %1323 = vpow2.f32 %v1112_v45 }
0x13bc   :  { %v1324_v46 = vpop.eup %1323 }
0x13bd   :  { %v834_v47 = vadd.f32 1.0, %v1324_v46 }
0x13bf   :  { %1325 = vrcp.f32 %v834_v47 }
0x13cc   :  { %v1326_v48 = vpop.eup %1325 }
0x13cd   :  { %v837_v49 = vmul.f32 2.0, %v1326_v48  ;;  %v842_v54 = vmul.f32 %v1326_v48, %v840_v53 }
0x13cf   :  { %v1113_v50 = vadd.f32 -1.0, %v837_v49 }
0x13d1   :  { %844 = vrot.lane.b32.xlu0 %v1113_v50, %s1399_s0 }
0x1443   :  { %v845_v51 = vpop.permute.xlu0 %844 }
0x1444   :  { %v847_v52 = vmul.f32 %v1326_v48, %v845_v51 }
0x1446   :  { %849 = vrot.lane.b32.xlu1 %v847_v52, %s1403_s18 }
0x14b8   :  { %v850_v55 = vpop.permute.xlu1 %849 }
0x14b9   :  { %v852_v56 = vadd.f32 %v850_v55, %v842_v54 }
0x14bb   :  { %1327 = vtanh.f32 %v852_v56 }
0x14c8   :  { %v1328_v16 = vpop.eup %1327 }
0x14c9   :  { %855 = vrot.lane.b32.xlu0 %v1328_v16, %s1399_s0 }
0x153b   :  { %v856_v61 = vpop.permute.xlu0 %855 }
0x153c   :  { %v858_v62 = vmul.f32 %v1326_v48, %v856_v61 }
0x153e   :  { %1329 = vtanh.f32 %v858_v62 }
0x154b   :  { %v1330_v25 = vpop.eup %1329 }
0x154c   :  { %v861_v63 = vrot.slane %v1330_v25, 7 }
0x154e   :  { %862 = vrot.lane.b32.xlu1 %v861_v63, %s1403_s18 }
0x15c0   :  { %v863_v0 = vpop.permute.xlu1 %862 }
0x15c1   :  { %1252 = vmatmul.mubr.msk.f32.vlgmr.msra.gmra.mxu1 %vm104_vm1, %v863_v0 }
0x1681   :  { %v932_v2 = vpop.f32.mrf.mxu1 }
0x1682   :  { %v933_v27 = vadd.f32 %v932_v2, %v36_v1 }
0x1683   :  { %v1253_v3 = vpop.f32.mrf.mxu1 }
0x1684   :  { %v1115_v4 = vmul.f32 -1.442695, %v933_v27 }
0x1686   :  { %1331 = vpow2.f32 %v1115_v4 }
0x1693   :  { %v1332_v28 = vpop.eup %1331 }
0x1694   :  { %v939_v5 = vadd.f32 1.0, %v1332_v28 }
0x1696   :  { %1333 = vrcp.f32 %v939_v5 }
0x16a3   :  { %v1334_v29 = vpop.eup %1333 }
0x16a4   :  { %v942_v6 = vmul.f32 2.0, %v1334_v29 }
0x16a6   :  { %v1116_v7 = vadd.f32 -1.0, %v942_v6 }
0x16a8   :  { %945 = vrot.lane.b32.xlu0 %v1116_v7, %s1399_s0 }
0x171a   :  { %v946_v8 = vpop.permute.xlu0 %945 }
0x171b   :  { %v948_v9 = vmul.f32 %v1334_v29, %v946_v8 }
0x171d   :  { %1335 = vtanh.f32 %v948_v9 }
0x172a   :  { %v1336_v10 = vpop.eup %1335 }
0x172b   :  { %951 = vrot.lane.b32.xlu1 %v1336_v10, %s1402_s1 }
0x179d   :  { %v952_v15 = vpop.permute.xlu1 %951 }
0x179e   :  { %v954_v17 = vmul.f32 %v1334_v29, %v952_v15 }
0x17a0   :  { %1337 = vtanh.f32 %v954_v17 }
0x17ad   :  { %v1338_v18 = vpop.eup %1337 }
0x17ae   :  { %957 = vrot.lane.b32.xlu0 %v1338_v18, %s1403_s18 }
0x1820   :  { %v958_v19 = vpop.permute.xlu0 %957 }
0x1821   :  { %1263 = vmatmul.mubr.msk.f32.vlgmr.msra.gmra.mxu0 %vm104_vm1, %v958_v19 }
0x18e1   :  { %v1027_v21 = vpop.f32.mrf.mxu0 }
0x18e2   :  { %v1028_v22 = vadd.f32 %v1027_v21, %v41_v20 }
0x18e3   :  { %v1264_v23 = vpop.f32.mrf.mxu0 }
0x18e4   :  { %v1118_v24 = vmul.f32 -1.442695, %v1028_v22 }
0x18e6   :  { %1339 = vpow2.f32 %v1118_v24 }
0x18f3   :  { %v1340_v30 = vpop.eup %1339 }
0x18f4   :  { %v1034_v31 = vadd.f32 1.0, %v1340_v30 }
0x18f6   :  { %1341 = vrcp.f32 %v1034_v31 }
0x1903   :  { %v1342_v26 = vpop.eup %1341 }
0x1904   :  { %v1037_v32 = vmul.f32 2.0, %v1342_v26 }
0x1906   :  { %v1119_v33 = vadd.f32 -1.0, %v1037_v32 }
0x1908   :  { %1040 = vrot.lane.b32.xlu1 %v1119_v33, %s1399_s0 }
0x190c   :  { %1051 = vrot.lane.b32.xlu1 %v42_v34, %s1402_s1 }
0x197a   :  { %v1041_v35 = vpop.permute.xlu1 %1040 }
0x197b   :  { %v1043_v36 = vmul.f32 %v1342_v26, %v1041_v35 }
0x197d   :  { %1343 = vtanh.f32 %v1043_v36 }
0x197e   :  { %v1052_v39 = vpop.permute.xlu1 %1051 }
0x198a   :  { %v1344_v37 = vpop.eup %1343 }
0x198b   :  { %1046 = vrot.lane.b32.xlu0 %v1344_v37, %s1402_s1 }
0x19fd   :  { %v1047_v38 = vpop.permute.xlu0 %1046 }
0x19fe   :  { %v1049_v40 = vmul.f32 %v1342_v26, %v1047_v38 }
0x1a00   :  { %v1054_v41 = vmul.f32 %v1052_v39, %v1049_v40 }
0x1a02   :  { %1056 = vrot.lane.b32.xlu0 %v1054_v41, %s1403_s18 }
0x1a74   :  { %v1057_v42 = vpop.permute.xlu0 %1056 }
0x1a75   :  { %v1060_v43 = vsel %vm1059_vm2, %v1057_v42, 0.0 }
0x1a76   :  { %1061 = vadd.xlane.f32.xlu1 %v1060_v43 }
0x1aff   :  { %v1062_v45 = vpop.xlane.xlu1 %1061 }
0x1b00   :  { %v1063_v46 = vadd.f32 %v1062_v45, %v43_v44 }
0x1b02   :  { %v1120_v47 = vmul.f32 -1.442695, %v1063_v46 }
0x1b04   :  { %1345 = vpow2.f32 %v1120_v47 }
0x1b11   :  { %v1346_v48 = vpop.eup %1345 }
0x1b12   :  { %v1067_v49 = vadd.f32 1.0, %v1346_v48 }
0x1b14   :  { %1347 = vrcp.f32 %v1067_v49 }
0x1b21   :  { %v1348_v50 = vpop.eup %1347 }
0x1b22   :  { %1071 = vst.msk [vmem:[#allocation5] sm:$0x1] %vm1070_vm3, %v1348_v50 }
0x1b23   :  { %1380 = shalt.err (!%p1377_p9)
}
0x1b24   :  { %1081 = dma.vmem_to_hbm [thread:$0]  %s1079_s20, 16, %s1579_s2, [#allocation4]  }
0x1b25   :  { %1391 = dma.done.wait [#allocation4], 16  }
0x1b26   :  { %1392 = vsyncadd [#allocation4], 4294967280 }
0x1b27   :  { %1085 = vsyncpa [#allocation3], 1 }
0x1b28   :  { %1086 = vsyncpa [#allocation4], 1 }

</bundles_post_ra>
